<compile_context>
chip_gen: v7x
topology: tpu7x:2x2x1
jax: 0.10.0
libtpu: 0.0.40
codegen_flags: <defaults>
</compile_context>

<pallas_src>
import functools
import math

import jax
import jax.numpy as jnp
from jax import lax
from jax.experimental import pallas as pl
from jax.experimental.pallas import tpu as pltpu

_MIB = 1024 * 1024
_ROWS_PER_GROUP = 8        # sublane-group height for 32-bit lanes
_MAX_GROUPS_PER_BLOCK = 8  # caps tile_h at 64 rows (bounded kernel unroll)


def _cdiv(a: int, b: int) -> int:
    return -(-a // b)


def _vmem_capacity_bytes() -> int:
    try:
        cap = int(pltpu.get_tpu_info().vmem_capacity_bytes)
        if cap > 0:
            return cap
    except Exception:
        pass
    return 64 * _MIB  # conservative: assume the smallest (v7x-sized) VMEM


def _make_vflip_kernel(tile_h: int):
    def kernel(x_ref, o_ref):
        # Reverse rows within the block; block-level mirroring along H is done
        # by the output BlockSpec index_map.  (Negative-step ref slicing is
        # unsupported in Mosaic, so reverse with unrolled row copies.)
        for i in range(tile_h):
            o_ref[:, i, :] = x_ref[:, tile_h - 1 - i, :]
    return kernel


def _choose_tiles(lead: int, h_groups: int, w32: int, target_bytes: int):
    """Pick (tile_nc, groups_per_block) for blocks of (tile_nc, 8*g, w32) u32."""
    group_bytes = _ROWS_PER_GROUP * w32 * 4  # one 8-row group of one image
    tile_nc = max(1, min(lead, target_bytes // max(1, group_bytes)))
    g = 1
    if tile_nc == lead:  # whole N*C fits in one block -> also grow along H
        budget_groups = max(1, target_bytes // max(1, tile_nc * group_bytes))
        cap = min(_MAX_GROUPS_PER_BLOCK, budget_groups, h_groups)
        for cand in range(cap, 0, -1):
            if h_groups % cand == 0:  # mirrored index_map needs exact division
                g = cand
                break
    # Keep at least two grid blocks when possible so megacore sharding and
    # pipeline overlap have something to work with (perf-review item).
    num_h_blocks = h_groups // g
    num_nc_blocks = _cdiv(lead, tile_nc)
    if num_h_blocks * num_nc_blocks < 2:
        if h_groups >= 2:
            for cand in range(max(1, h_groups // 2), 0, -1):
                if h_groups % cand == 0:
                    g = cand
                    break
        elif lead >= 2:
            tile_nc = _cdiv(lead, 2)
    return tile_nc, g


def _vflip_32bit(x32: jax.Array) -> jax.Array:
    """Flip a (lead, Hp, W32) array of 4-byte elements (Hp % 8 == 0) along Hp."""
    lead, hp, w32 = x32.shape
    h_groups = hp // _ROWS_PER_GROUP

    capacity = _vmem_capacity_bytes()
    target = min(8 * _MIB, capacity // 8)  # generation-aware per-block target
    tile_nc, g = _choose_tiles(lead, h_groups, w32, target)
    tile_h = g * _ROWS_PER_GROUP
    num_h_blocks = h_groups // g
    num_nc_blocks = _cdiv(lead, tile_nc)
    block_bytes = tile_nc * tile_h * w32 * 4
    # TODO(synk): no W tiling; a single (1, 8, W) stripe must fit VMEM (fine for images).

    # Deeper input buffering only pays off for small blocks with enough steps.
    num_steps = num_h_blocks * num_nc_blocks
    small = block_bytes < 1 * _MIB and num_steps >= 4
    in_spec_kwargs = {"pipeline_mode": pl.Buffered(3)} if small else {}
    in_buffers = 3 if small else 2

    vmem_limit = min(
        capacity * 3 // 4,
        max(32 * _MIB, (in_buffers + 2) * block_bytes + 8 * _MIB),
    )

    return pl.pallas_call(
        _make_vflip_kernel(tile_h),
        out_shape=jax.ShapeDtypeStruct((lead, hp, w32), x32.dtype),
        grid=(num_nc_blocks, num_h_blocks),
        in_specs=[
            pl.BlockSpec((tile_nc, tile_h, w32),
                         lambda nc, h: (nc, h, 0), **in_spec_kwargs),
        ],
        out_specs=pl.BlockSpec(
            (tile_nc, tile_h, w32),
            # mirrored H block index: input block h -> output block (last - h)
            lambda nc, h, nhb=num_h_blocks: (nc, nhb - 1 - h, 0),
        ),
        compiler_params=pltpu.CompilerParams(
            dimension_semantics=("parallel", "parallel"),
            vmem_limit_bytes=int(vmem_limit),
        ),
    )(x32)


@functools.partial(jax.jit, static_argnames=("flip",))
def vertical_flip(img: jax.Array, flip: bool = True) -> jax.Array:
    """Vertically flip an image tensor along dim=-2 (like torchvision TF.vflip)."""
    if not flip:
        return img
    assert img.ndim >= 2, "vflip expects at least an (H, W) tensor"
    orig_shape = img.shape
    H, W = orig_shape[-2], orig_shape[-1]
    lead = int(math.prod(orig_shape[:-2]))
    x = img.reshape(lead, H, W)

    itemsize = img.dtype.itemsize
    if itemsize > 4:
        # TODO(synk): 64-bit dtypes (x64 mode) are not routed through the kernel.
        raise NotImplementedError("vertical_flip kernel supports itemsize <= 4")

    # --- canonicalise to 32-bit lanes (sub-32-bit dtypes viewed as uint32) ---
    ratio = 4 // itemsize
    pad_w = (-W) % ratio
    if pad_w:
        x = jnp.pad(x, ((0, 0), (0, 0), (0, pad_w)))
    Wp = W + pad_w
    if ratio > 1:
        x32 = lax.bitcast_convert_type(
            x.reshape(lead, H, Wp // ratio, ratio), jnp.uint32)
    else:
        x32 = x  # 4-byte dtypes run natively (the kernel is dtype-agnostic)
    W32 = Wp // ratio

    # --- pad H to a multiple of the sublane group (no full-H fallback) ---
    pad_h = (-H) % _ROWS_PER_GROUP
    if pad_h:
        x32 = jnp.pad(x32, ((0, 0), (0, pad_h), (0, 0)))

    y32 = _vflip_32bit(x32)

    # --- undo padding / 32-bit view ---
    if pad_h:
        y32 = y32[:, pad_h:, :]  # flipped pad rows land at the top
    if ratio > 1:
        y = lax.bitcast_convert_type(y32, img.dtype).reshape(lead, H, Wp)
    else:
        y = y32
    if pad_w:
        y = y[:, :, :W]
    return y.reshape(orig_shape)


if __name__ == "__main__":
    key = jax.random.PRNGKey(0)

    # Small NCHW input consistent with the module: batch=2, channels=4, 16x16.
    x = jax.random.normal(key, (2, 4, 16, 16), dtype=jnp.float32)
    y = jax.block_until_ready(vertical_flip(x, flip=True))
    assert y.shape == x.shape and y.dtype == x.dtype
    assert bool(jnp.array_equal(y, jnp.flip(x, axis=-2))), "vflip mismatch"

    # flip=False passthrough (module semantics).
    y_noop = jax.block_until_ready(vertical_flip(x, flip=False))
    assert bool(jnp.array_equal(y_noop, x))

    # Unfriendly H (not a multiple of 8) exercises the pad-and-slice fallback.
    x2 = jax.random.normal(jax.random.PRNGKey(0), (2, 3, 20, 16), jnp.float32)
    y2 = jax.block_until_ready(vertical_flip(x2, flip=True))
    assert bool(jnp.array_equal(y2, jnp.flip(x2, axis=-2))), "padded vflip mismatch"

    print("KERNEL_OK")
</pallas_src>

<mosaic_0001>
module attributes {stable_mosaic.version = 11 : i64} {
  func.func @kernel(%arg0: i32, %arg1: i32, %arg2: memref<8x8x16xf32, #tpu.memory_space<vmem>>, %arg3: memref<8x8x16xf32, #tpu.memory_space<vmem>>) attributes {dimension_semantics = [#tpu.dimension_semantics<parallel>, #tpu.dimension_semantics<parallel>], iteration_bounds = array<i64: 1, 2>, scalar_prefetch = 0 : i64, scratch_operands = 0 : i64, tpu.core_type = #tpu.core_type<tc>, window_params = [{transform_indices = @transform_0, window_bounds = array<i64: 8, 8, 16>}, {transform_indices = @transform_1, window_bounds = array<i64: 8, 8, 16>}]} {
    %c0 = arith.constant 0 : index
    %c7 = arith.constant 7 : index
    %c0_0 = arith.constant 0 : index
    %0 = vector.load %arg2[%c0, %c7, %c0_0] : memref<8x8x16xf32, #tpu.memory_space<vmem>>, vector<8x1x16xf32>
    %1 = vector.shape_cast %0 : vector<8x1x16xf32> to vector<8x16xf32>
    %c0_1 = arith.constant 0 : index
    %c0_2 = arith.constant 0 : index
    %c0_3 = arith.constant 0 : index
    %2 = vector.load %arg3[%c0_1, %c0_2, %c0_3] : memref<8x8x16xf32, #tpu.memory_space<vmem>>, vector<8x1x16xf32>
    %3 = vector.shape_cast %2 : vector<8x1x16xf32> to vector<8x16xf32>
    %4 = vector.shape_cast %1 : vector<8x16xf32> to vector<8x1x16xf32>
    tpu.vector_store %arg3[%c0_1, %c0_2, %c0_3], %4 {strides = array<i32>} : memref<8x8x16xf32, #tpu.memory_space<vmem>>, vector<8x1x16xf32>,
    %c0_4 = arith.constant 0 : index
    %c6 = arith.constant 6 : index
    %c0_5 = arith.constant 0 : index
    %5 = vector.load %arg2[%c0_4, %c6, %c0_5] : memref<8x8x16xf32, #tpu.memory_space<vmem>>, vector<8x1x16xf32>
    %6 = vector.shape_cast %5 : vector<8x1x16xf32> to vector<8x16xf32>
    %c0_6 = arith.constant 0 : index
    %c1 = arith.constant 1 : index
    %c0_7 = arith.constant 0 : index
    %7 = vector.load %arg3[%c0_6, %c1, %c0_7] : memref<8x8x16xf32, #tpu.memory_space<vmem>>, vector<8x1x16xf32>
    %8 = vector.shape_cast %7 : vector<8x1x16xf32> to vector<8x16xf32>
    %9 = vector.shape_cast %6 : vector<8x16xf32> to vector<8x1x16xf32>
    tpu.vector_store %arg3[%c0_6, %c1, %c0_7], %9 {strides = array<i32>} : memref<8x8x16xf32, #tpu.memory_space<vmem>>, vector<8x1x16xf32>,
    %c0_8 = arith.constant 0 : index
    %c5 = arith.constant 5 : index
    %c0_9 = arith.constant 0 : index
    %10 = vector.load %arg2[%c0_8, %c5, %c0_9] : memref<8x8x16xf32, #tpu.memory_space<vmem>>, vector<8x1x16xf32>
    %11 = vector.shape_cast %10 : vector<8x1x16xf32> to vector<8x16xf32>
    %c0_10 = arith.constant 0 : index
    %c2 = arith.constant 2 : index
    %c0_11 = arith.constant 0 : index
    %12 = vector.load %arg3[%c0_10, %c2, %c0_11] : memref<8x8x16xf32, #tpu.memory_space<vmem>>, vector<8x1x16xf32>
    %13 = vector.shape_cast %12 : vector<8x1x16xf32> to vector<8x16xf32>
    %14 = vector.shape_cast %11 : vector<8x16xf32> to vector<8x1x16xf32>
    tpu.vector_store %arg3[%c0_10, %c2, %c0_11], %14 {strides = array<i32>} : memref<8x8x16xf32, #tpu.memory_space<vmem>>, vector<8x1x16xf32>,
    %c0_12 = arith.constant 0 : index
    %c4 = arith.constant 4 : index
    %c0_13 = arith.constant 0 : index
    %15 = vector.load %arg2[%c0_12, %c4, %c0_13] : memref<8x8x16xf32, #tpu.memory_space<vmem>>, vector<8x1x16xf32>
    %16 = vector.shape_cast %15 : vector<8x1x16xf32> to vector<8x16xf32>
    %c0_14 = arith.constant 0 : index
    %c3 = arith.constant 3 : index
    %c0_15 = arith.constant 0 : index
    %17 = vector.load %arg3[%c0_14, %c3, %c0_15] : memref<8x8x16xf32, #tpu.memory_space<vmem>>, vector<8x1x16xf32>
    %18 = vector.shape_cast %17 : vector<8x1x16xf32> to vector<8x16xf32>
    %19 = vector.shape_cast %16 : vector<8x16xf32> to vector<8x1x16xf32>
    tpu.vector_store %arg3[%c0_14, %c3, %c0_15], %19 {strides = array<i32>} : memref<8x8x16xf32, #tpu.memory_space<vmem>>, vector<8x1x16xf32>,
    %c0_16 = arith.constant 0 : index
    %c3_17 = arith.constant 3 : index
    %c0_18 = arith.constant 0 : index
    %20 = vector.load %arg2[%c0_16, %c3_17, %c0_18] : memref<8x8x16xf32, #tpu.memory_space<vmem>>, vector<8x1x16xf32>
    %21 = vector.shape_cast %20 : vector<8x1x16xf32> to vector<8x16xf32>
    %c0_19 = arith.constant 0 : index
    %c4_20 = arith.constant 4 : index
    %c0_21 = arith.constant 0 : index
    %22 = vector.load %arg3[%c0_19, %c4_20, %c0_21] : memref<8x8x16xf32, #tpu.memory_space<vmem>>, vector<8x1x16xf32>
    %23 = vector.shape_cast %22 : vector<8x1x16xf32> to vector<8x16xf32>
    %24 = vector.shape_cast %21 : vector<8x16xf32> to vector<8x1x16xf32>
    tpu.vector_store %arg3[%c0_19, %c4_20, %c0_21], %24 {strides = array<i32>} : memref<8x8x16xf32, #tpu.memory_space<vmem>>, vector<8x1x16xf32>,
    %c0_22 = arith.constant 0 : index
    %c2_23 = arith.constant 2 : index
    %c0_24 = arith.constant 0 : index
    %25 = vector.load %arg2[%c0_22, %c2_23, %c0_24] : memref<8x8x16xf32, #tpu.memory_space<vmem>>, vector<8x1x16xf32>
    %26 = vector.shape_cast %25 : vector<8x1x16xf32> to vector<8x16xf32>
    %c0_25 = arith.constant 0 : index
    %c5_26 = arith.constant 5 : index
    %c0_27 = arith.constant 0 : index
    %27 = vector.load %arg3[%c0_25, %c5_26, %c0_27] : memref<8x8x16xf32, #tpu.memory_space<vmem>>, vector<8x1x16xf32>
    %28 = vector.shape_cast %27 : vector<8x1x16xf32> to vector<8x16xf32>
    %29 = vector.shape_cast %26 : vector<8x16xf32> to vector<8x1x16xf32>
    tpu.vector_store %arg3[%c0_25, %c5_26, %c0_27], %29 {strides = array<i32>} : memref<8x8x16xf32, #tpu.memory_space<vmem>>, vector<8x1x16xf32>,
    %c0_28 = arith.constant 0 : index
    %c1_29 = arith.constant 1 : index
    %c0_30 = arith.constant 0 : index
    %30 = vector.load %arg2[%c0_28, %c1_29, %c0_30] : memref<8x8x16xf32, #tpu.memory_space<vmem>>, vector<8x1x16xf32>
    %31 = vector.shape_cast %30 : vector<8x1x16xf32> to vector<8x16xf32>
    %c0_31 = arith.constant 0 : index
    %c6_32 = arith.constant 6 : index
    %c0_33 = arith.constant 0 : index
    %32 = vector.load %arg3[%c0_31, %c6_32, %c0_33] : memref<8x8x16xf32, #tpu.memory_space<vmem>>, vector<8x1x16xf32>
    %33 = vector.shape_cast %32 : vector<8x1x16xf32> to vector<8x16xf32>
    %34 = vector.shape_cast %31 : vector<8x16xf32> to vector<8x1x16xf32>
    tpu.vector_store %arg3[%c0_31, %c6_32, %c0_33], %34 {strides = array<i32>} : memref<8x8x16xf32, #tpu.memory_space<vmem>>, vector<8x1x16xf32>,
    %c0_34 = arith.constant 0 : index
    %c0_35 = arith.constant 0 : index
    %c0_36 = arith.constant 0 : index
    %35 = vector.load %arg2[%c0_34, %c0_35, %c0_36] : memref<8x8x16xf32, #tpu.memory_space<vmem>>, vector<8x1x16xf32>
    %36 = vector.shape_cast %35 : vector<8x1x16xf32> to vector<8x16xf32>
    %c0_37 = arith.constant 0 : index
    %c7_38 = arith.constant 7 : index
    %c0_39 = arith.constant 0 : index
    %37 = vector.load %arg3[%c0_37, %c7_38, %c0_39] : memref<8x8x16xf32, #tpu.memory_space<vmem>>, vector<8x1x16xf32>
    %38 = vector.shape_cast %37 : vector<8x1x16xf32> to vector<8x16xf32>
    %39 = vector.shape_cast %36 : vector<8x16xf32> to vector<8x1x16xf32>
    tpu.vector_store %arg3[%c0_37, %c7_38, %c0_39], %39 {strides = array<i32>} : memref<8x8x16xf32, #tpu.memory_space<vmem>>, vector<8x1x16xf32>,
    return
  }
  func.func @transform_0(%arg0: i32, %arg1: i32) -> (i32, i32, i32) {
    %c0_i32 = arith.constant 0 : i32
    %c0_i32_0 = arith.constant 0 : i32
    return %arg0, %arg1, %c0_i32 : i32, i32, i32
  }
  func.func @transform_1(%arg0: i32, %arg1: i32) -> (i32, i32, i32) {
    %c1_i32 = arith.constant 1 : i32
    %0 = arith.subi %c1_i32, %arg1 : i32
    %c0_i32 = arith.constant 0 : i32
    %c0_i32_0 = arith.constant 0 : i32
    return %arg0, %0, %c0_i32 : i32, i32, i32
  }
}

</mosaic_0001>

<bundles_post_ra>
// kernel: vertical_flip.1
= control target key start
LH: loop header
LB: loop body
LE: loop exit
PB: predicated region body
PF: predicated region fallthrough
CT: control target
= control target key end

     0   :  { %6 = vsyncpa [#allocation3], 0  ;;  %s1059_s0 = inlined_call_operand.hbm [shape: f32[8,16,16], index: 0, kind: input, shape index: {}]   ;;  %s1060_s1 = inlined_call_operand.hbm [shape: f32[8,16,16], index: 1, kind: output, shape index: {}]  }
   0x1   :  { %8 = vsyncpa [#allocation3 + $0x1], 0 }
   0x2   :  { %9 = vsyncpa [#allocation4], 0 }
   0x3   :  { %11 = vsyncpa [#allocation4 + $0x1], 0  ;;  %s650_s6 = smov 0   ;;  %s652_s7 = smov 0  }
   0x4   :  { %s654_s8 = smov 0   ;;  %s656_s9 = smov 0  }
   0x5   :  { %s658_s10 = smov 0   ;;  %s660_s11 = smov 0  }
   0x6   :  { %s662_s12 = smov 0   ;;  %s664_s13 = smov 0  }
   0x7   :  { %s666_s14 = smov 0  }
   0x8 LB: > { %s389_s15 = sadd.s32 4294967295, %s630_s14   ;;  %s390_s16 = sadd.s32 4294967294, %s630_s14   ;;  %s630_s14 = sphi %s666_s14, %s17_s14   ;;  %s626_s13 = sphi %s664_s13, %s1078_s13   ;;  %s622_s12 = sphi %s662_s12, %s1077_s12   ;;  %s618_s11 = sphi %s660_s11, %s1076_s11   ;;  %s614_s10 = sphi %s658_s10, %s1075_s10   ;;  %s610_s9 = sphi %s656_s9, %s1074_s9   ;;  %s606_s8 = sphi %s654_s8, %s1073_s8   ;;  %s602_s7 = sphi %s652_s7, %s1072_s7   ;;  %s598_s6 = sphi %s650_s6, %s1071_s6  }
   0x9   : > { %s26_s17 = sadd.s32 1, %s626_s13  ;;  %s38_s18 = sadd.s32 1, %s618_s11 }
   0xa   : > { %p27_p0 = scmp.ge.s32.totalorder %s26_s17, 2  ;;  %p45_p1 = scmp.ne.s32.totalorder %s618_s11, %s614_s10 }
   0xb   : > { %p46_p2 = scmp.eq.s32.totalorder %s630_s14, 0  ;;  %p51_p3 = scmp.ne.s32.totalorder %s614_s10, %s610_s9 }
   0xc   : > { %s1080_s17 = smov (%p27_p0, %s26_s17), 0  ;;  %p52_p5 = scmp.eq.s32.totalorder %s389_s15, 0 }
   0xd   : > { %p703_p4 = por %p46_p2, %p45_p1  ;;  %s34_s20 = ssub.s32 %s626_s13, %s1080_s17 }
   0xe   : > { %s61_s21 = ssub.s32 1, %s626_s13  ;;  %p36_p6 = scmp.eq.s32.totalorder %s34_s20, 0 }
   0xf   : > { %p710_p7 = por %p52_p5, %p51_p3  ;;  %s62_s23 = ssub.s32 1, %s1080_s17 }
  0x10   : > { %s68_s24 = sadd.s32 1, %s606_s8  ;;  %s64_s26 = ssub.s32 %s61_s21, %s62_s23 }
  0x11   : > { %s717_s25 = scalar_select %p36_p6, %s618_s11, %s38_s18  }
  0x12   : > { %p78_p8 = scmp.ne.s32.totalorder %s606_s8, %s602_s7  ;;  %p66_p9 = scmp.eq.s32.totalorder %s64_s26, 0 }
  0x13   : > { %p79_p10 = scmp.eq.s32.totalorder %s389_s15, 1  ;;  %p84_p11 = scmp.ne.s32.totalorder %s602_s7, %s598_s6 }
  0x14   : > { %p85_p12 = scmp.eq.s32.totalorder %s390_s16, 1  ;;  %p414_p2 = scmp.lt.s32.totalorder %s630_s14, 2 }
  0x15   : > { %s724_s27 = scalar_select %p66_p9, %s606_s8, %s68_s24  }
  0x16   : > { %p726_p13 = por %p79_p10, %p78_p8  ;;  %p730_p0 = por %p85_p12, %p84_p11 }
  0x17   : > { %s105_s30 = sand.u32 1, %s618_s11   ;;  %s394_s2 = sshll.u32 %s626_s13, 7 }
  0x18   : > { %s1064_s28 = scalar_select %p726_p13, 1, 0 }
  0x19   : > { %s1065_s29 = scalar_select %p730_p0, 1, 0 }
  0x1a   : > { %s393_s3 = sshll.u32 %s105_s30, 6  ;;  %s741_s9 = scalar_lea.hbm %s1059_s0, %s394_s2 }
  0x1b   : > { %s109_s15 = scalar_lea.vmem [#allocation2], %s393_s3  ;;  %p745_p3 = pnand %p414_p2, %p703_p4 }
  0x1c   : > { %s118_s16 = sshll.u32 %s109_s15, 4  ;;  %s752_s20 = scalar_lea.sflag [#allocation3], %s105_s30  ;;  %s749_s16 = int_to_ptr.vmem [resolvable:$true] %s118_s16 }
  0x1d   : > { %s494_s21 = scalar_lea.hbm %s741_s9, 1024  ;;  %p496_p8 = pneg %p745_p3 }
  0x1e   : > { %p495_p6 = scmp.ne.s32.totalorder %s741_s9, %s494_s21  ;;  %s499_s24 = scalar_lea.hbm %s1059_s0, 2048 }
  0x1f   : > { %p500_p4 = scmp.lt.u32.totalorder %s741_s9, %s1059_s0  ;;  %p501_p11 = scmp.lt.u32.totalorder %s499_s24, %s494_s21 }
  0x20   : > { %p497_p9 = pnand %p496_p8, %p495_p6  ;;  %p503_p2 = scmp.lt.u32.totalorder %s494_s21, %s741_s9 }
  0x21   : > { %p502_p12 = por %p501_p11, %p500_p4 }
  0x22   : > { %p498_p10 = pneg %p497_p9 }
  0x23   : > { %p504_p1 = por %p503_p2, %p502_p12 }
  0x25   : > { %p505_p5 = pnand %p504_p1, %p498_p10 }
  0x27   : > { %508 = shalt.err (!%p505_p5)
}
  0x28   : > { %s509_s30 = scalar_lea.vmem %s749_s16, 1024  ;;  %s632_s3 = smov [#allocation2]  }
  0x29   : > { %p510_p6 = scmp.ne.s32.totalorder %s749_s16, %s509_s30  ;;  %s514_s4 = sshll.u32 %s632_s3, 4  ;;  %s515_s4 = int_to_ptr.vmem [resolvable:$false] %s514_s4 }
  0x2a   : > { %s516_s5 = scalar_lea.vmem %s515_s4, 2048  ;;  %p517_p13 = scmp.lt.s32.totalorder %s749_s16, %s515_s4 }
  0x2b   : > { %p512_p9 = pnand %p510_p6, %p496_p8  ;;  %p518_p4 = scmp.lt.s32.totalorder %s516_s5, %s509_s30 }
  0x2d   : > { %p513_p0 = pneg %p512_p9  ;;  %p519_p11 = por %p518_p4, %p517_p13 }
  0x2f   : > { %p520_p12 = pnand %p519_p11, %p513_p0 }
  0x31   : > { %523 = shalt.err (!%p520_p12)
}
  0x32   : > { %s633_s15 = smov 256   ;;  %s634_s21 = smov 128  }
  0x33   : > { %s635_s19 = smov 8   ;;  %p126_p1 = scmp.lt.s32.totalorder %s630_s14, 3 }
  0x34   : > { %409 = dma.hbm_to_vmem [thread:$0]  (!%p745_p3), %s741_s9, 1024, %s749_s16, %s752_s20, %s633_s15, %s634_s21, %s635_s19  }
  0x35   : > { %p1067_p5 = scmp.ge.s32.totalorder %s630_s14, 1 }
  0x37   : > { %p127_p8 = pnand %p1067_p5, %p126_p1 }
  0x38   : > { %s132_s23 = sand.u32 (!%p127_p8), 1, %s614_s10  }
  0x39   : > { %130 = sbr.rel (%p127_p8) target bundleno = 134 (0x86), region = 24  ;;  %s396_s24 = sshll.u32 (!%p127_p8), %s132_s23, 6 }
  0x3a   : > { %s133_s26 = scalar_lea.sflag (!%p127_p8), [#allocation3], %s132_s23  ;;  %s784_s2 = scalar_lea.vmem (!%p127_p8), [#allocation2], %s396_s24 }
  0x40   : > { %589 = dma.done.wait (%p710_p7), %s133_s26, 1024  }
  0x41   : > { %591 = vsyncadd (%p710_p7), %s133_s26, 4294966272  ;;  %s152_s9 = sand.u32 1, %s602_s7   ;;  %s295_s18 = ssub.s32 1, %s622_s12  ;;  %vm166_vm0 = vcmask 122880   ;;  %v158_v0 = vld [vmem:[%s784_s2 + $0x7] sm:$0x1] }
  0x42   : > { %s397_s16 = sshll.u32 %s152_s9, 6  ;;  %s794_s20 = sshll.u32 %s295_s18, 7  ;;  %v159_v1 = vld [vmem:[%s784_s2 + $0xf] sm:$0x1]  ;;  %v160_v2 = vld [vmem:[%s784_s2 + $0x17] sm:$0x1] }
  0x43   : > { %s796_s22 = scalar_lea.vmem [#allocation5], %s397_s16  ;;  %v161_v3 = vld [vmem:[%s784_s2 + $0x1f] sm:$0x1]  ;;  %v162_v4 = vld [vmem:[%s784_s2 + $0x27] sm:$0x1]  ;;  %s986_s4 = scalar_lea.hbm %s1060_s1, %s794_s20 }
  0x44   : > { %s304_s30 = sshll.u32 %s796_s22, 4  ;;  %167 = vst.msk [vmem:[%s796_s22] sm:$0x1] %vm166_vm0, %v158_v0  ;;  %168 = vst.msk [vmem:[%s796_s22 + $0x8] sm:$0x1] %vm166_vm0, %v159_v1  ;;  %s1003_s5 = scalar_lea.sflag [#allocation4], %s152_s9  ;;  %s990_s30 = int_to_ptr.vmem [resolvable:$true] %s304_s30 }
  0x45   : > { %169 = vst.msk [vmem:[%s796_s22 + $0x10] sm:$0x1] %vm166_vm0, %v160_v2  ;;  %v163_v5 = vld [vmem:[%s784_s2 + $0x2f] sm:$0x1]  ;;  %170 = vst.msk [vmem:[%s796_s22 + $0x18] sm:$0x1] %vm166_vm0, %v161_v3 }
  0x46   : > { %171 = vst.msk [vmem:[%s796_s22 + $0x20] sm:$0x1] %vm166_vm0, %v162_v4  ;;  %172 = vst.msk [vmem:[%s796_s22 + $0x28] sm:$0x1] %vm166_vm0, %v163_v5  ;;  %v164_v6 = vld [vmem:[%s784_s2 + $0x37] sm:$0x1] }
  0x47   : > { %v165_v7 = vld [vmem:[%s784_s2 + $0x3f] sm:$0x1]  ;;  %v175_v8 = vld [vmem:[%s784_s2 + $0x6] sm:$0x1]  ;;  %173 = vst.msk [vmem:[%s796_s22 + $0x30] sm:$0x1] %vm166_vm0, %v164_v6 }
  0x48   : > { %174 = vst.msk [vmem:[%s796_s22 + $0x38] sm:$0x1] %vm166_vm0, %v165_v7  ;;  %183 = vst.msk [vmem:[%s796_s22 + $0x1] sm:$0x1] %vm166_vm0, %v175_v8  ;;  %v176_v9 = vld [vmem:[%s784_s2 + $0xe] sm:$0x1] }
  0x49   : > { %v177_v10 = vld [vmem:[%s784_s2 + $0x16] sm:$0x1]  ;;  %v178_v11 = vld [vmem:[%s784_s2 + $0x1e] sm:$0x1]  ;;  %184 = vst.msk [vmem:[%s796_s22 + $0x9] sm:$0x1] %vm166_vm0, %v176_v9 }
  0x4a   : > { %185 = vst.msk [vmem:[%s796_s22 + $0x11] sm:$0x1] %vm166_vm0, %v177_v10  ;;  %186 = vst.msk [vmem:[%s796_s22 + $0x19] sm:$0x1] %vm166_vm0, %v178_v11  ;;  %v179_v12 = vld [vmem:[%s784_s2 + $0x26] sm:$0x1] }
  0x4b   : > { %v180_v13 = vld [vmem:[%s784_s2 + $0x2e] sm:$0x1]  ;;  %v181_v14 = vld [vmem:[%s784_s2 + $0x36] sm:$0x1]  ;;  %187 = vst.msk [vmem:[%s796_s22 + $0x21] sm:$0x1] %vm166_vm0, %v179_v12 }
  0x4c   : > { %188 = vst.msk [vmem:[%s796_s22 + $0x29] sm:$0x1] %vm166_vm0, %v180_v13  ;;  %189 = vst.msk [vmem:[%s796_s22 + $0x31] sm:$0x1] %vm166_vm0, %v181_v14  ;;  %v182_v15 = vld [vmem:[%s784_s2 + $0x3e] sm:$0x1] }
  0x4d   : > { %v191_v16 = vld [vmem:[%s784_s2 + $0x5] sm:$0x1]  ;;  %v192_v17 = vld [vmem:[%s784_s2 + $0xd] sm:$0x1]  ;;  %190 = vst.msk [vmem:[%s796_s22 + $0x39] sm:$0x1] %vm166_vm0, %v182_v15 }
  0x4e   : > { %199 = vst.msk [vmem:[%s796_s22 + $0x2] sm:$0x1] %vm166_vm0, %v191_v16  ;;  %200 = vst.msk [vmem:[%s796_s22 + $0xa] sm:$0x1] %vm166_vm0, %v192_v17  ;;  %v193_v18 = vld [vmem:[%s784_s2 + $0x15] sm:$0x1] }
  0x4f   : > { %v194_v19 = vld [vmem:[%s784_s2 + $0x1d] sm:$0x1]  ;;  %v195_v20 = vld [vmem:[%s784_s2 + $0x25] sm:$0x1]  ;;  %201 = vst.msk [vmem:[%s796_s22 + $0x12] sm:$0x1] %vm166_vm0, %v193_v18 }
  0x50   : > { %202 = vst.msk [vmem:[%s796_s22 + $0x1a] sm:$0x1] %vm166_vm0, %v194_v19  ;;  %203 = vst.msk [vmem:[%s796_s22 + $0x22] sm:$0x1] %vm166_vm0, %v195_v20  ;;  %v196_v21 = vld [vmem:[%s784_s2 + $0x2d] sm:$0x1] }
  0x51   : > { %v197_v22 = vld [vmem:[%s784_s2 + $0x35] sm:$0x1]  ;;  %v198_v23 = vld [vmem:[%s784_s2 + $0x3d] sm:$0x1]  ;;  %204 = vst.msk [vmem:[%s796_s22 + $0x2a] sm:$0x1] %vm166_vm0, %v196_v21 }
  0x52   : > { %205 = vst.msk [vmem:[%s796_s22 + $0x32] sm:$0x1] %vm166_vm0, %v197_v22  ;;  %206 = vst.msk [vmem:[%s796_s22 + $0x3a] sm:$0x1] %vm166_vm0, %v198_v23  ;;  %v207_v24 = vld [vmem:[%s784_s2 + $0x4] sm:$0x1] }
  0x53   : > { %v208_v25 = vld [vmem:[%s784_s2 + $0xc] sm:$0x1]  ;;  %v209_v26 = vld [vmem:[%s784_s2 + $0x14] sm:$0x1]  ;;  %215 = vst.msk [vmem:[%s796_s22 + $0x3] sm:$0x1] %vm166_vm0, %v207_v24 }
  0x54   : > { %216 = vst.msk [vmem:[%s796_s22 + $0xb] sm:$0x1] %vm166_vm0, %v208_v25  ;;  %217 = vst.msk [vmem:[%s796_s22 + $0x13] sm:$0x1] %vm166_vm0, %v209_v26  ;;  %v210_v27 = vld [vmem:[%s784_s2 + $0x1c] sm:$0x1] }
  0x55   : > { %v211_v28 = vld [vmem:[%s784_s2 + $0x24] sm:$0x1]  ;;  %v212_v29 = vld [vmem:[%s784_s2 + $0x2c] sm:$0x1]  ;;  %218 = vst.msk [vmem:[%s796_s22 + $0x1b] sm:$0x1] %vm166_vm0, %v210_v27 }
  0x56   : > { %219 = vst.msk [vmem:[%s796_s22 + $0x23] sm:$0x1] %vm166_vm0, %v211_v28  ;;  %220 = vst.msk [vmem:[%s796_s22 + $0x2b] sm:$0x1] %vm166_vm0, %v212_v29  ;;  %v213_v30 = vld [vmem:[%s784_s2 + $0x34] sm:$0x1] }
  0x57   : > { %v214_v31 = vld [vmem:[%s784_s2 + $0x3c] sm:$0x1]  ;;  %v223_v32 = vld [vmem:[%s784_s2 + $0x3] sm:$0x1]  ;;  %221 = vst.msk [vmem:[%s796_s22 + $0x33] sm:$0x1] %vm166_vm0, %v213_v30 }
  0x58   : > { %222 = vst.msk [vmem:[%s796_s22 + $0x3b] sm:$0x1] %vm166_vm0, %v214_v31  ;;  %231 = vst.msk [vmem:[%s796_s22 + $0x4] sm:$0x1] %vm166_vm0, %v223_v32  ;;  %v224_v33 = vld [vmem:[%s784_s2 + $0xb] sm:$0x1] }
  0x59   : > { %v225_v34 = vld [vmem:[%s784_s2 + $0x13] sm:$0x1]  ;;  %v226_v35 = vld [vmem:[%s784_s2 + $0x1b] sm:$0x1]  ;;  %232 = vst.msk [vmem:[%s796_s22 + $0xc] sm:$0x1] %vm166_vm0, %v224_v33 }
  0x5a   : > { %233 = vst.msk [vmem:[%s796_s22 + $0x14] sm:$0x1] %vm166_vm0, %v225_v34  ;;  %234 = vst.msk [vmem:[%s796_s22 + $0x1c] sm:$0x1] %vm166_vm0, %v226_v35  ;;  %v227_v36 = vld [vmem:[%s784_s2 + $0x23] sm:$0x1] }
  0x5b   : > { %v228_v37 = vld [vmem:[%s784_s2 + $0x2b] sm:$0x1]  ;;  %v229_v38 = vld [vmem:[%s784_s2 + $0x33] sm:$0x1]  ;;  %235 = vst.msk [vmem:[%s796_s22 + $0x24] sm:$0x1] %vm166_vm0, %v227_v36 }
  0x5c   : > { %236 = vst.msk [vmem:[%s796_s22 + $0x2c] sm:$0x1] %vm166_vm0, %v228_v37  ;;  %237 = vst.msk [vmem:[%s796_s22 + $0x34] sm:$0x1] %vm166_vm0, %v229_v38  ;;  %v230_v39 = vld [vmem:[%s784_s2 + $0x3b] sm:$0x1] }
  0x5d   : > { %v239_v40 = vld [vmem:[%s784_s2 + $0x2] sm:$0x1]  ;;  %v240_v41 = vld [vmem:[%s784_s2 + $0xa] sm:$0x1]  ;;  %238 = vst.msk [vmem:[%s796_s22 + $0x3c] sm:$0x1] %vm166_vm0, %v230_v39 }
  0x5e   : > { %247 = vst.msk [vmem:[%s796_s22 + $0x5] sm:$0x1] %vm166_vm0, %v239_v40  ;;  %248 = vst.msk [vmem:[%s796_s22 + $0xd] sm:$0x1] %vm166_vm0, %v240_v41  ;;  %v241_v42 = vld [vmem:[%s784_s2 + $0x12] sm:$0x1] }
  0x5f   : > { %v242_v43 = vld [vmem:[%s784_s2 + $0x1a] sm:$0x1]  ;;  %v243_v44 = vld [vmem:[%s784_s2 + $0x22] sm:$0x1]  ;;  %249 = vst.msk [vmem:[%s796_s22 + $0x15] sm:$0x1] %vm166_vm0, %v241_v42 }
  0x60   : > { %250 = vst.msk [vmem:[%s796_s22 + $0x1d] sm:$0x1] %vm166_vm0, %v242_v43  ;;  %251 = vst.msk [vmem:[%s796_s22 + $0x25] sm:$0x1] %vm166_vm0, %v243_v44  ;;  %v244_v45 = vld [vmem:[%s784_s2 + $0x2a] sm:$0x1] }
  0x61   : > { %v245_v46 = vld [vmem:[%s784_s2 + $0x32] sm:$0x1]  ;;  %v246_v47 = vld [vmem:[%s784_s2 + $0x3a] sm:$0x1]  ;;  %252 = vst.msk [vmem:[%s796_s22 + $0x2d] sm:$0x1] %vm166_vm0, %v244_v45 }
  0x62   : > { %253 = vst.msk [vmem:[%s796_s22 + $0x35] sm:$0x1] %vm166_vm0, %v245_v46  ;;  %254 = vst.msk [vmem:[%s796_s22 + $0x3d] sm:$0x1] %vm166_vm0, %v246_v47  ;;  %v255_v48 = vld [vmem:[%s784_s2 + $0x1] sm:$0x1] }
  0x63   : > { %v256_v49 = vld [vmem:[%s784_s2 + $0x9] sm:$0x1]  ;;  %v257_v50 = vld [vmem:[%s784_s2 + $0x11] sm:$0x1]  ;;  %263 = vst.msk [vmem:[%s796_s22 + $0x6] sm:$0x1] %vm166_vm0, %v255_v48 }
  0x64   : > { %264 = vst.msk [vmem:[%s796_s22 + $0xe] sm:$0x1] %vm166_vm0, %v256_v49  ;;  %265 = vst.msk [vmem:[%s796_s22 + $0x16] sm:$0x1] %vm166_vm0, %v257_v50  ;;  %v258_v51 = vld [vmem:[%s784_s2 + $0x19] sm:$0x1] }
  0x65   : > { %v259_v52 = vld [vmem:[%s784_s2 + $0x21] sm:$0x1]  ;;  %v260_v53 = vld [vmem:[%s784_s2 + $0x29] sm:$0x1]  ;;  %266 = vst.msk [vmem:[%s796_s22 + $0x1e] sm:$0x1] %vm166_vm0, %v258_v51 }
  0x66   : > { %267 = vst.msk [vmem:[%s796_s22 + $0x26] sm:$0x1] %vm166_vm0, %v259_v52  ;;  %268 = vst.msk [vmem:[%s796_s22 + $0x2e] sm:$0x1] %vm166_vm0, %v260_v53  ;;  %v261_v54 = vld [vmem:[%s784_s2 + $0x31] sm:$0x1] }
  0x67   : > { %v262_v55 = vld [vmem:[%s784_s2 + $0x39] sm:$0x1]  ;;  %v271_v56 = vld [vmem:[%s784_s2] sm:$0x1]  ;;  %269 = vst.msk [vmem:[%s796_s22 + $0x36] sm:$0x1] %vm166_vm0, %v261_v54 }
  0x68   : > { %270 = vst.msk [vmem:[%s796_s22 + $0x3e] sm:$0x1] %vm166_vm0, %v262_v55  ;;  %279 = vst.msk [vmem:[%s796_s22 + $0x7] sm:$0x1] %vm166_vm0, %v271_v56  ;;  %v272_v57 = vld [vmem:[%s784_s2 + $0x8] sm:$0x1] }
  0x69   : > { %v273_v58 = vld [vmem:[%s784_s2 + $0x10] sm:$0x1]  ;;  %v274_v59 = vld [vmem:[%s784_s2 + $0x18] sm:$0x1]  ;;  %280 = vst.msk [vmem:[%s796_s22 + $0xf] sm:$0x1] %vm166_vm0, %v272_v57 }
  0x6a   : > { %281 = vst.msk [vmem:[%s796_s22 + $0x17] sm:$0x1] %vm166_vm0, %v273_v58  ;;  %282 = vst.msk [vmem:[%s796_s22 + $0x1f] sm:$0x1] %vm166_vm0, %v274_v59  ;;  %v275_v60 = vld [vmem:[%s784_s2 + $0x20] sm:$0x1] }
  0x6b   : > { %v276_v61 = vld [vmem:[%s784_s2 + $0x28] sm:$0x1]  ;;  %v277_v62 = vld [vmem:[%s784_s2 + $0x30] sm:$0x1]  ;;  %283 = vst.msk [vmem:[%s796_s22 + $0x27] sm:$0x1] %vm166_vm0, %v275_v60 }
  0x6c   : > { %284 = vst.msk [vmem:[%s796_s22 + $0x2f] sm:$0x1] %vm166_vm0, %v276_v61  ;;  %285 = vst.msk [vmem:[%s796_s22 + $0x37] sm:$0x1] %vm166_vm0, %v277_v62  ;;  %v278_v63 = vld [vmem:[%s784_s2 + $0x38] sm:$0x1] }
  0x6d   : > { %286 = vst.msk [vmem:[%s796_s22 + $0x3f] sm:$0x1] %vm166_vm0, %v278_v63  ;;  %s524_s15 = scalar_lea.vmem %s990_s30, 1024  ;;  %p1068_p13 = scmp.ne.s32.totalorder %s1064_s28, 0 }
  0x6e   : > { %p525_p7 = scmp.ne.s32.totalorder %s990_s30, %s524_s15  ;;  %s636_s21 = smov [#allocation5]  }
  0x6f   : > { %s528_s19 = sshll.u32 %s636_s21, 4  ;;  %s529_s19 = int_to_ptr.vmem [resolvable:$false] %s528_s19 }
  0x70   : > { %p526_p0 = pnand %p525_p7, %p1068_p13  ;;  %s530_s23 = scalar_lea.vmem %s529_s19, 2048 }
  0x71   : > { %p531_p10 = scmp.lt.s32.totalorder %s990_s30, %s529_s19  ;;  %p532_p2 = scmp.lt.s32.totalorder %s530_s23, %s524_s15 }
  0x72   : > { %p527_p3 = pneg %p526_p0 }
  0x73   : > { %p533_p6 = por %p532_p2, %p531_p10 }
  0x75   : > { %p534_p9 = pnand %p533_p6, %p527_p3 }
  0x77   : > { %537 = shalt.err (!%p534_p9)
}
  0x78   : > { %s538_s24 = scalar_lea.hbm %s986_s4, 1024  ;;  %s542_s9 = scalar_lea.hbm %s1060_s1, 2048 }
  0x79   : > { %p539_p4 = scmp.ne.s32.totalorder %s986_s4, %s538_s24  ;;  %p543_p1 = scmp.lt.u32.totalorder %s986_s4, %s1060_s1 }
  0x7a   : > { %p544_p5 = scmp.lt.u32.totalorder %s542_s9, %s538_s24  ;;  %p546_p7 = scmp.lt.u32.totalorder %s538_s24, %s986_s4 }
  0x7b   : > { %p540_p11 = pnand %p539_p4, %p1068_p13 }
  0x7c   : > { %p545_p8 = por %p544_p5, %p543_p1 }
  0x7d   : > { %p541_p12 = pneg %p540_p11 }
  0x7e   : > { %p547_p0 = por %p546_p7, %p545_p8 }
  0x80   : > { %p548_p3 = pnand %p547_p0, %p541_p12 }
  0x82   : > { %551 = shalt.err (!%p548_p3)
}
  0x83   : > { %s637_s20 = smov 128   ;;  %s638_s22 = smov 256  }
  0x84   : > { %s639_s12 = smov 8  }
  0x85   : > { %404 = dma.vmem_to_hbm [thread:$0]  (%p1068_p13), %s990_s30, 1024, %s986_s4, %s1003_s5, %s637_s20, %s638_s22, %s639_s12  }
  0x86 PF: > { %s319_s3 = sand.u32 1, %s598_s6   ;;  %p1069_p10 = scmp.ne.s32.totalorder %s1065_s29, 0 }
  0x87   : > { %p1070_p2 = scmp.ge.s32.totalorder %s630_s14, 2  ;;  %s320_s15 = scalar_lea.sflag [#allocation4], %s319_s3 }
  0x89   : > { %p411_p6 = pnand %p1070_p2, %p1069_p10 }
  0x8b   : > { %593 = dma.done.wait (!%p411_p6), %s320_s15, 1024  }
  0x8c   : > { %595 = vsyncadd (!%p411_p6), %s320_s15, 4294966272  ;;  %s17_s14 = sadd.s32 1, %s630_s14   ;;  %s1071_s6 = smov %s602_s7 }
  0x8d   : > { %p14_p9 = scmp.ge.s32.totalorder %s17_s14, 4   ;;  %s1072_s7 = smov %s606_s8 }
  0x8e   : > { %s1073_s8 = smov %s724_s27  ;;  %s1074_s9 = smov %s614_s10 }
  0x8f   : > { %s1075_s10 = smov %s618_s11  ;;  %s1076_s11 = smov %s717_s25 }
  0x90   : > { %s1077_s12 = smov %s626_s13  ;;  %s1078_s13 = smov %s1080_s17 }
  0x91   :  { %16 = sbr.rel (!%p14_p9) target bundleno = 8 (0x8), region = 69 }
  0x98   :  { %325 = vsyncpa [#allocation3], 1 }
  0x99   :  { %327 = vsyncpa [#allocation3 + $0x1], 1 }
  0x9a   :  { %328 = vsyncpa [#allocation4], 1 }
  0x9b   :  { %330 = vsyncpa [#allocation4 + $0x1], 1 }

</bundles_post_ra>
